<compile_context>
chip_gen: v5e
topology: v5e:2x2
jax: 0.10.0
libtpu: 0.0.40
codegen_flags: <defaults>
</compile_context>

<pallas_src>
import functools

import jax
import jax.numpy as jnp
import numpy as np
from jax.experimental import pallas as pl
from jax.experimental.pallas import tpu as pltpu

LRELU_SLOPE = 0.01   # nn.LeakyReLU default
BN_EPS = 1e-5        # nn.BatchNorm2d default


# ----------------------------------------------------------------------------
# Fused Block kernel (upsample + concat + conv1 + BN + LReLU + conv2 + LReLU)
# ----------------------------------------------------------------------------
def _block_kernel(x_ref, sk_ref, u0_ref, u1_ref, r0_ref, r1_ref, upb_ref,
                  t1_ref, b1_ref, gam_ref, bet_ref, red_ref, bc_ref,
                  t2_ref, b2_ref, o_ref,
                  cat_ref, h1_ref, s1_ref, s2_ref,
                  *, k, wcu, oh1, oh2, cnt):
    """Grid = (phase, batch).  Phase 0: ConvTranspose(2,2,s=2) + concat +
    conv3x3 -> h1 (kept in VMEM scratch) + per-channel sum / sum-of-squares.
    Phase 1: BatchNorm(batch stats) + LeakyReLU + conv3x3 + LeakyReLU -> out.
    Activations are 2-D slabs [rows=y, cols=(x, c)]; each conv is K
    width-Toeplitz matmuls with shifted-row accumulation (no im2col)."""
    phase = pl.program_id(0)
    b = pl.program_id(1)

    @pl.when(jnp.logical_and(phase == 0, b == 0))
    def _init_stats():
        s1_ref[...] = jnp.zeros_like(s1_ref)
        s2_ref[...] = jnp.zeros_like(s2_ref)

    @pl.when(phase == 0)
    def _upsample_conv1_stats():
        x_b = x_ref[0]                                   # [h, w*cin]   bf16
        # ConvTranspose2d(2,2,s=2): two half-row matmuls (even / odd output
        # rows), then 0/1 placement matmuls interleave them -- no reshape.
        ta = jnp.dot(x_b, u0_ref[...], preferred_element_type=jnp.float32)
        tb = jnp.dot(x_b, u1_ref[...], preferred_element_type=jnp.float32)
        up = (jnp.dot(r0_ref[...], ta, preferred_element_type=jnp.float32) +
              jnp.dot(r1_ref[...], tb, preferred_element_type=jnp.float32) +
              upb_ref[...])                              # [h2, w2*c_up] f32

        # Channel concat folded into one contraction: pack up/skip side by
        # side in VMEM, conv1 Toeplitz slabs are stacked to match.
        cat_ref[:, :wcu] = up.astype(cat_ref.dtype)
        cat_ref[:, wcu:] = sk_ref[0]
        cat = cat_ref[...]                               # [h2, w2*c_in] bf16

        acc = None
        for di in range(k):                              # K taps, one dot each
            y = jnp.dot(cat, t1_ref[di], preferred_element_type=jnp.float32)
            contrib = y[di:di + oh1, :]                  # single shifted slice
            acc = contrib if acc is None else acc + contrib
        h1 = acc + b1_ref[...]                           # [oh1, ow1*c_mid] f32
        h1_ref[b] = h1                                   # VMEM-resident

        # BN partial sums: column sums then a linear-size per-channel reduce.
        col1 = jnp.sum(h1, axis=0, keepdims=True)        # [1, ow1*c_mid]
        col2 = jnp.sum(h1 * h1, axis=0, keepdims=True)
        s1_ref[...] += jnp.dot(col1, red_ref[...],
                               preferred_element_type=jnp.float32)
        s2_ref[...] += jnp.dot(col2, red_ref[...],
                               preferred_element_type=jnp.float32)

    @pl.when(phase == 1)
    def _bn_conv2():
        inv_cnt = 1.0 / cnt
        mean_c = s1_ref[...] * inv_cnt                   # [1, c_mid]
        var_c = jnp.maximum(s2_ref[...] * inv_cnt - mean_c * mean_c, 0.0)
        inv_c = jax.lax.rsqrt(var_c + BN_EPS)
        scale_c = inv_c * gam_ref[...]
        shift_c = bet_ref[...] - mean_c * scale_c
        # Broadcast per-channel scale/shift back to (x, c) columns.
        scale_r = jnp.dot(scale_c, bc_ref[...],
                          preferred_element_type=jnp.float32)
        shift_r = jnp.dot(shift_c, bc_ref[...],
                          preferred_element_type=jnp.float32)

        h = h1_ref[b] * scale_r + shift_r
        h = jnp.maximum(h, LRELU_SLOPE * h).astype(t2_ref.dtype)

        acc = None
        for di in range(k):
            y = jnp.dot(h, t2_ref[di], preferred_element_type=jnp.float32)
            contrib = y[di:di + oh2, :]
            acc = contrib if acc is None else acc + contrib
        out = acc + b2_ref[...]
        out = jnp.maximum(out, LRELU_SLOPE * out)
        # TODO(synk): ow2*c_out (=48 here) is < 128 lanes -> masked stores;
        # pack rows into a lane-dense slab if this matters at production size.
        o_ref[b] = out.astype(o_ref.dtype)


def block_apply(x3d, sk3d, st, *, out_dtype):
    """x3d: [n, h, w*c_in_prev] bf16, sk3d: [n, 2h, 2w*c_sk] bf16.
    Returns [n, oh2, ow2*c_out] in out_dtype."""
    n, h, _ = x3d.shape
    k = st["k"]
    h2 = 2 * h
    oh1 = h2 - k + 1
    oh2 = oh1 - k + 1
    wcu = st["wcu"]
    w2cin = st["t1"].shape[1]
    ow1cm = st["t2"].shape[1]
    ow2co = st["t2"].shape[2]
    c_mid = st["c_mid"]
    ow1 = ow1cm // c_mid

    kern = functools.partial(_block_kernel, k=k, wcu=wcu, oh1=oh1, oh2=oh2,
                             cnt=float(n * oh1 * ow1))

    def full(a):
        return pl.BlockSpec(a.shape, lambda p, b, nd=a.ndim: (0,) * nd)

    return pl.pallas_call(
        kern,
        out_shape=jax.ShapeDtypeStruct((n, oh2, ow2co), out_dtype),
        grid=(2, n),                      # (phase, batch)
        in_specs=[
            pl.BlockSpec((1, h, x3d.shape[2]), lambda p, b: (b, 0, 0)),
            pl.BlockSpec((1, h2, sk3d.shape[2]), lambda p, b: (b, 0, 0)),
            full(st["u0"]), full(st["u1"]), full(st["r0"]), full(st["r1"]),
            full(st["upb"]), full(st["t1"]), full(st["b1"]),
            full(st["gamma"]), full(st["beta"]), full(st["red"]),
            full(st["bc"]), full(st["t2"]), full(st["b2"]),
        ],
        out_specs=pl.BlockSpec((n, oh2, ow2co), lambda p, b: (0, 0, 0)),
        scratch_shapes=[
            pltpu.VMEM((h2, w2cin), jnp.bfloat16),        # packed conv1 input
            pltpu.VMEM((n, oh1, ow1cm), jnp.float32),     # resident h1
            pltpu.VMEM((1, c_mid), jnp.float32),          # sum
            pltpu.VMEM((1, c_mid), jnp.float32),          # sum of squares
        ],
        compiler_params=pltpu.CompilerParams(
            dimension_semantics=("arbitrary", "arbitrary"),
            vmem_limit_bytes=48 * 1024 * 1024),
    )(x3d, sk3d, st["u0"], st["u1"], st["r0"], st["r1"], st["upb"],
      st["t1"], st["b1"], st["gamma"], st["beta"], st["red"], st["bc"],
      st["t2"], st["b2"])


# ----------------------------------------------------------------------------
# One-time parameter re-arrangement (PyTorch layout -> matmul-ready matrices)
# ----------------------------------------------------------------------------
def _build_toeplitz(w_c, w_in, ci_lo, ci_hi):
    """Valid stride-1 conv along width as K Toeplitz matmuls.
    w_c: [Cout, Cin_total, K, K].  Returns T [K, w_in*cs, (w_in-K+1)*Cout]."""
    cout, _, k, _ = w_c.shape
    cs = ci_hi - ci_lo
    ow = w_in - k + 1
    t = np.zeros((k, w_in * cs, ow * cout), np.float32)
    for di in range(k):
        for ox in range(ow):
            for dj in range(k):
                x = ox + dj
                t[di, x * cs:(x + 1) * cs, ox * cout:(ox + 1) * cout] = \
                    w_c[:, ci_lo:ci_hi, di, dj].T
    return t


def _build_up_halves(w_t, b, w_in):
    """ConvTranspose2d(2,2,s=2): per output-row-parity matrices.
    w_t: [Cin, Cout, 2, 2].  U_kh [W*Cin, 2W*Cout]; bias [1, 2W*Cout]."""
    cin, cout = w_t.shape[0], w_t.shape[1]
    w2 = 2 * w_in
    mats = np.zeros((2, w_in * cin, w2 * cout), np.float32)
    for kh in range(2):
        for x in range(w_in):
            for kw in range(2):
                r0 = x * cin
                c0 = (2 * x + kw) * cout
                mats[kh, r0:r0 + cin, c0:c0 + cout] = w_t[:, :, kh, kw]
    bias = np.tile(np.asarray(b, np.float32), w2)[None, :]
    return mats[0], mats[1], bias


def prepare_params(raw_params, channels, kernel_size, x_shape):
    """Re-arrange PyTorch-layout parameters once into matmul-ready matrices,
    shape-specialised to the input geometry."""
    _, _, h_cur, w_cur = x_shape
    k = kernel_size
    prepared = []
    for i, raw in enumerate(raw_params):
        c_in, c_out = channels[i], channels[i + 1]
        c_up, c_sk, c_mid = c_out, c_in - c_out, 2 * c_out
        h2, w2 = 2 * h_cur, 2 * w_cur
        ow1 = w2 - k + 1
        ow2 = ow1 - k + 1

        up_w = np.asarray(raw["up_w"], np.float32)
        up_b = np.asarray(raw["up_b"], np.float32)
        c1_w = np.asarray(raw["c1_w"], np.float32)
        c1_b = np.asarray(raw["c1_b"], np.float32)
        gam = np.asarray(raw["bn_gamma"], np.float32)
        bet = np.asarray(raw["bn_beta"], np.float32)
        c2_w = np.asarray(raw["c2_w"], np.float32)
        c2_b = np.asarray(raw["c2_b"], np.float32)

        u0, u1, upb = _build_up_halves(up_w, up_b, w_cur)

        # 0/1 row-placement matrices: even / odd output rows of the upsample.
        r0 = np.zeros((h2, h_cur), np.float32)
        r1 = np.zeros((h2, h_cur), np.float32)
        for y in range(h_cur):
            r0[2 * y, y] = 1.0
            r1[2 * y + 1, y] = 1.0

        # Stacked conv1 Toeplitz: [up-channel rows ; skip-channel rows].
        t1_up = _build_toeplitz(c1_w, w2, 0, c_up)
        t1_sk = _build_toeplitz(c1_w, w2, c_up, c_in)
        t1 = np.concatenate([t1_up, t1_sk], axis=1)

        # Linear-size per-channel reduce selector (replaces the quadratic
        # pool matrix); its transpose broadcasts channel stats back to (x,c).
        ch = np.arange(ow1 * c_mid) % c_mid
        red = (ch[:, None] == np.arange(c_mid)[None, :]).astype(np.float32)

        prepared.append(dict(
            k=k, c_in=c_in, c_up=c_up, c_sk=c_sk, c_mid=c_mid, c_out=c_out,
            wcu=w2 * c_up,
            u0=jnp.asarray(u0, jnp.bfloat16),
            u1=jnp.asarray(u1, jnp.bfloat16),
            r0=jnp.asarray(r0, jnp.float32),
            r1=jnp.asarray(r1, jnp.float32),
            upb=jnp.asarray(upb, jnp.float32),
            t1=jnp.asarray(t1, jnp.bfloat16),
            b1=jnp.asarray(np.tile(c1_b, ow1)[None, :], jnp.float32),
            gamma=jnp.asarray(gam[None, :], jnp.float32),
            beta=jnp.asarray(bet[None, :], jnp.float32),
            red=jnp.asarray(red, jnp.float32),
            bc=jnp.asarray(red.T, jnp.float32),
            t2=jnp.asarray(_build_toeplitz(c2_w, ow1, 0, c_mid), jnp.bfloat16),
            b2=jnp.asarray(np.tile(c2_b, ow2)[None, :], jnp.float32),
        ))
        h_cur = 2 * h_cur - 2 * (k - 1)
        w_cur = 2 * w_cur - 2 * (k - 1)
    return prepared


# ----------------------------------------------------------------------------
# Forward pass
# ----------------------------------------------------------------------------
def up_forward(prepared, x_nchw, skip_connections):
    """Forward of `Up`.  Public layout is NCHW; internally NHWC slabs
    [n, y, (x, c)], converted exactly once per external boundary."""
    n = x_nchw.shape[0]
    nhwc = jnp.transpose(x_nchw, (0, 2, 3, 1))
    _, h0, w0, c0 = nhwc.shape
    act = nhwc.reshape(n, h0, w0 * c0).astype(jnp.bfloat16)

    n_stages = len(prepared)
    for i, st in enumerate(prepared):
        h = act.shape[1]
        w = act.shape[2] // st["c_in"]
        h2, w2 = 2 * h, 2 * w

        # Center-crop the skip (int(round(..)) matches torchvision
        # CenterCrop); NCHW -> NHWC once, at the input boundary.
        skip = skip_connections[i]
        hs, ws = skip.shape[2], skip.shape[3]
        top = int(round((hs - h2) / 2.0))
        left = int(round((ws - w2) / 2.0))
        skip = skip[:, :, top:top + h2, left:left + w2]
        sk3d = jnp.transpose(skip, (0, 2, 3, 1)).reshape(
            n, h2, w2 * st["c_sk"]).astype(jnp.bfloat16)

        out_dtype = jnp.float32 if i == n_stages - 1 else jnp.bfloat16
        act = block_apply(act, sk3d, st, out_dtype=out_dtype)

    c_out = prepared[-1]["c_out"]
    _, hh, wc = act.shape
    out = act.reshape(n, hh, wc // c_out, c_out)
    return jnp.transpose(out, (0, 3, 1, 2))               # back to NCHW


# ----------------------------------------------------------------------------
# Pure-JAX f32 reference (for validation only)
# ----------------------------------------------------------------------------
def _ref_conv2d(x, w, b):
    k = w.shape[2]
    oh, ow = x.shape[2] - k + 1, x.shape[3] - k + 1
    acc = None
    for di in range(k):
        for dj in range(k):
            t = jnp.einsum("nchw,dc->ndhw",
                           x[:, :, di:di + oh, dj:dj + ow], w[:, :, di, dj])
            acc = t if acc is None else acc + t
    return acc + b[None, :, None, None]


def reference_up(raw_params, x, skip_connections):
    up = x
    for i, p in enumerate(raw_params):
        n, _, h, w = up.shape
        cout = p["up_w"].shape[1]
        y = jnp.einsum("nchw,cdab->ndhawb", up, p["up_w"])
        y = y.reshape(n, cout, 2 * h, 2 * w) + p["up_b"][None, :, None, None]
        skip = skip_connections[i]
        hs, ws = skip.shape[2], skip.shape[3]
        top = int(round((hs - 2 * h) / 2.0))
        left = int(round((ws - 2 * w) / 2.0))
        cat = jnp.concatenate(
            [y, skip[:, :, top:top + 2 * h, left:left + 2 * w]], axis=1)
        h1 = _ref_conv2d(cat, p["c1_w"], p["c1_b"])
        mean = jnp.mean(h1, axis=(0, 2, 3), keepdims=True)
        var = jnp.mean(jnp.square(h1 - mean), axis=(0, 2, 3), keepdims=True)
        h1 = (h1 - mean) * jax.lax.rsqrt(var + BN_EPS)
        h1 = (h1 * p["bn_gamma"][None, :, None, None]
              + p["bn_beta"][None, :, None, None])
        h1 = jnp.maximum(h1, LRELU_SLOPE * h1)
        h2c = _ref_conv2d(h1, p["c2_w"], p["c2_b"])
        up = jnp.maximum(h2c, LRELU_SLOPE * h2c)
    return up


# ----------------------------------------------------------------------------
if __name__ == "__main__":
    # Up(channels=(8, 4), kernel_size=3); skip[i] carries
    # channels[i] - channels[i+1] channels so the concat matches Block's
    # in_channels = channels[i].
    channels = (8, 4)
    kernel_size = 3

    key = jax.random.PRNGKey(0)
    keys = jax.random.split(key, 2 + (len(channels) - 1))

    raw_params = []
    for i in range(len(channels) - 1):
        cin, cout = channels[i], channels[i + 1]
        kk = jax.random.split(keys[i], 6)
        raw_params.append(dict(
            up_w=0.1 * jax.random.normal(kk[0], (cin, cout, 2, 2), jnp.float32),
            up_b=0.1 * jax.random.normal(kk[1], (cout,), jnp.float32),
            c1_w=0.1 * jax.random.normal(
                kk[2], (2 * cout, cin, kernel_size, kernel_size), jnp.float32),
            c1_b=0.1 * jax.random.normal(kk[3], (2 * cout,), jnp.float32),
            bn_gamma=jnp.ones((2 * cout,), jnp.float32),   # PyTorch BN init
            bn_beta=jnp.zeros((2 * cout,), jnp.float32),
            c2_w=0.1 * jax.random.normal(
                kk[4], (cout, 2 * cout, kernel_size, kernel_size), jnp.float32),
            c2_b=0.1 * jax.random.normal(kk[5], (cout,), jnp.float32),
        ))

    x = jax.random.normal(keys[-1], (2, channels[0], 8, 8), jnp.float32)
    skip_connections = [
        jax.random.normal(
            keys[-2], (2, channels[i] - channels[i + 1], 18, 18), jnp.float32)
        for i in range(len(channels) - 1)
    ]

    prepared = prepare_params(raw_params, channels, kernel_size, x.shape)
    out = jax.block_until_ready(up_forward(prepared, x, skip_connections))

    # x: (2,8,8,8) -> up: (2,4,16,16) -> cat: (2,8,16,16)
    # -> conv1: (2,8,14,14) -> conv2: (2,4,12,12)
    assert out.shape == (2, channels[-1], 12, 12), out.shape
    assert bool(jnp.all(jnp.isfinite(out)))

    # Validate against the pure-JAX f32 reference (kernel uses bf16 MXU
    # operands, so allow a correspondingly small tolerance).
    ref = jax.block_until_ready(reference_up(raw_params, x, skip_connections))
    err = float(jnp.max(jnp.abs(out - ref)))
    assert err < 0.1, err
    print("KERNEL_OK")
</pallas_src>

<mosaic_0001>
module attributes {stable_mosaic.version = 11 : i64} {
  func.func @_block_kernel(%arg0: i32, %arg1: i32, %arg2: memref<1x8x64xbf16, #tpu.memory_space<vmem>>, %arg3: memref<1x16x64xbf16, #tpu.memory_space<vmem>>, %arg4: memref<64x64xbf16, #tpu.memory_space<vmem>>, %arg5: memref<64x64xbf16, #tpu.memory_space<vmem>>, %arg6: memref<16x8xf32, #tpu.memory_space<vmem>>, %arg7: memref<16x8xf32, #tpu.memory_space<vmem>>, %arg8: memref<1x64xf32, #tpu.memory_space<vmem>>, %arg9: memref<3x128x112xbf16, #tpu.memory_space<vmem>>, %arg10: memref<1x112xf32, #tpu.memory_space<vmem>>, %arg11: memref<1x8xf32, #tpu.memory_space<vmem>>, %arg12: memref<1x8xf32, #tpu.memory_space<vmem>>, %arg13: memref<112x8xf32, #tpu.memory_space<vmem>>, %arg14: memref<8x112xf32, #tpu.memory_space<vmem>>, %arg15: memref<3x112x48xbf16, #tpu.memory_space<vmem>>, %arg16: memref<1x48xf32, #tpu.memory_space<vmem>>, %arg17: memref<2x12x48xf32, #tpu.memory_space<vmem>>, %arg18: memref<16x128xbf16, #tpu.memory_space<vmem>>, %arg19: memref<2x14x112xf32, #tpu.memory_space<vmem>>, %arg20: memref<1x8xf32, #tpu.memory_space<vmem>>, %arg21: memref<1x8xf32, #tpu.memory_space<vmem>>) attributes {dimension_semantics = [#tpu.dimension_semantics<arbitrary>, #tpu.dimension_semantics<arbitrary>], iteration_bounds = array<i64: 2, 2>, scalar_prefetch = 0 : i64, scratch_operands = 4 : i64, tpu.core_type = #tpu.core_type<tc>, window_params = [{transform_indices = @transform_0, window_bounds = array<i64: 1, 8, 64>}, {transform_indices = @transform_1, window_bounds = array<i64: 1, 16, 64>}, {pipeline_mode = #tpu.pipeline_mode<synchronous>, transform_indices = @transform_2, window_bounds = array<i64: 64, 64>}, {pipeline_mode = #tpu.pipeline_mode<synchronous>, transform_indices = @transform_3, window_bounds = array<i64: 64, 64>}, {pipeline_mode = #tpu.pipeline_mode<synchronous>, transform_indices = @transform_4, window_bounds = array<i64: 16, 8>}, {pipeline_mode = #tpu.pipeline_mode<synchronous>, transform_indices = @transform_5, window_bounds = array<i64: 16, 8>}, {pipeline_mode = #tpu.pipeline_mode<synchronous>, transform_indices = @transform_6, window_bounds = array<i64: 1, 64>}, {pipeline_mode = #tpu.pipeline_mode<synchronous>, transform_indices = @transform_7, window_bounds = array<i64: 3, 128, 112>}, {pipeline_mode = #tpu.pipeline_mode<synchronous>, transform_indices = @transform_8, window_bounds = array<i64: 1, 112>}, {pipeline_mode = #tpu.pipeline_mode<synchronous>, transform_indices = @transform_9, window_bounds = array<i64: 1, 8>}, {pipeline_mode = #tpu.pipeline_mode<synchronous>, transform_indices = @transform_10, window_bounds = array<i64: 1, 8>}, {pipeline_mode = #tpu.pipeline_mode<synchronous>, transform_indices = @transform_11, window_bounds = array<i64: 112, 8>}, {pipeline_mode = #tpu.pipeline_mode<synchronous>, transform_indices = @transform_12, window_bounds = array<i64: 8, 112>}, {pipeline_mode = #tpu.pipeline_mode<synchronous>, transform_indices = @transform_13, window_bounds = array<i64: 3, 112, 48>}, {pipeline_mode = #tpu.pipeline_mode<synchronous>, transform_indices = @transform_14, window_bounds = array<i64: 1, 48>}, {pipeline_mode = #tpu.pipeline_mode<synchronous>, transform_indices = @transform_15, window_bounds = array<i64: 2, 12, 48>}]} {
    %c0_i32 = arith.constant 0 : i32
    %0 = arith.cmpi eq, %arg0, %c0_i32 : i32
    %c0_i32_0 = arith.constant 0 : i32
    %1 = arith.cmpi eq, %arg1, %c0_i32_0 : i32
    %2 = arith.andi %0, %1 : i1
    %3 = arith.extui %2 : i1 to i32
    %c0_i32_1 = arith.constant 0 : i32
    %4 = arith.cmpi ne, %3, %c0_i32_1 : i32
    scf.if %4 {
      %cst = arith.constant 0.000000e+00 : f32
      %11 = vector.broadcast %cst : f32 to vector<1x8xf32>
      %c0 = arith.constant 0 : index
      %c0_5 = arith.constant 0 : index
      %12 = vector.load %arg20[%c0, %c0_5] : memref<1x8xf32, #tpu.memory_space<vmem>>, vector<1x8xf32>
      tpu.vector_store %arg20[%c0, %c0_5], %11 {strides = array<i32>} : memref<1x8xf32, #tpu.memory_space<vmem>>, vector<1x8xf32>,
      %cst_6 = arith.constant 0.000000e+00 : f32
      %13 = vector.broadcast %cst_6 : f32 to vector<1x8xf32>
      %c0_7 = arith.constant 0 : index
      %c0_8 = arith.constant 0 : index
      %14 = vector.load %arg21[%c0_7, %c0_8] : memref<1x8xf32, #tpu.memory_space<vmem>>, vector<1x8xf32>
      tpu.vector_store %arg21[%c0_7, %c0_8], %13 {strides = array<i32>} : memref<1x8xf32, #tpu.memory_space<vmem>>, vector<1x8xf32>,
    } else {
    }
    %c0_i32_2 = arith.constant 0 : i32
    %5 = arith.cmpi eq, %arg0, %c0_i32_2 : i32
    %6 = arith.extui %5 : i1 to i32
    %c0_i32_3 = arith.constant 0 : i32
    %7 = arith.cmpi ne, %6, %c0_i32_3 : i32
    scf.if %7 {
      %c0 = arith.constant 0 : index
      %c0_5 = arith.constant 0 : index
      %c0_6 = arith.constant 0 : index
      %11 = vector.load %arg2[%c0, %c0_5, %c0_6] : memref<1x8x64xbf16, #tpu.memory_space<vmem>>, vector<1x8x64xbf16>
      %12 = vector.shape_cast %11 : vector<1x8x64xbf16> to vector<8x64xbf16>
      %c0_7 = arith.constant 0 : index
      %c0_8 = arith.constant 0 : index
      %13 = vector.load %arg4[%c0_7, %c0_8] : memref<64x64xbf16, #tpu.memory_space<vmem>>, vector<64x64xbf16>
      %cst = arith.constant dense<0.000000e+00> : vector<8x64xf32>
      %14 = tpu.matmul %12, %13, %cst {dimension_numbers = #tpu.dot_dimension_numbers<[1], [0], [0], [1], [0, 0, 1, 1], [], []>} : vector<8x64xbf16>, vector<64x64xbf16>, vector<8x64xf32> -> vector<8x64xf32>
      %c0_9 = arith.constant 0 : index
      %c0_10 = arith.constant 0 : index
      %15 = vector.load %arg5[%c0_9, %c0_10] : memref<64x64xbf16, #tpu.memory_space<vmem>>, vector<64x64xbf16>
      %cst_11 = arith.constant dense<0.000000e+00> : vector<8x64xf32>
      %16 = tpu.matmul %12, %15, %cst_11 {dimension_numbers = #tpu.dot_dimension_numbers<[1], [0], [0], [1], [0, 0, 1, 1], [], []>} : vector<8x64xbf16>, vector<64x64xbf16>, vector<8x64xf32> -> vector<8x64xf32>
      %c0_12 = arith.constant 0 : index
      %c0_13 = arith.constant 0 : index
      %17 = vector.load %arg6[%c0_12, %c0_13] : memref<16x8xf32, #tpu.memory_space<vmem>>, vector<16x8xf32>
      %cst_14 = arith.constant dense<0.000000e+00> : vector<16x64xf32>
      %18 = tpu.matmul %17, %14, %cst_14 {dimension_numbers = #tpu.dot_dimension_numbers<[1], [0], [0], [1], [0, 0, 1, 1], [], []>} : vector<16x8xf32>, vector<8x64xf32>, vector<16x64xf32> -> vector<16x64xf32>
      %c0_15 = arith.constant 0 : index
      %c0_16 = arith.constant 0 : index
      %19 = vector.load %arg7[%c0_15, %c0_16] : memref<16x8xf32, #tpu.memory_space<vmem>>, vector<16x8xf32>
      %cst_17 = arith.constant dense<0.000000e+00> : vector<16x64xf32>
      %20 = tpu.matmul %19, %16, %cst_17 {dimension_numbers = #tpu.dot_dimension_numbers<[1], [0], [0], [1], [0, 0, 1, 1], [], []>} : vector<16x8xf32>, vector<8x64xf32>, vector<16x64xf32> -> vector<16x64xf32>
      %21 = arith.addf %18, %20 : vector<16x64xf32>
      %c0_18 = arith.constant 0 : index
      %c0_19 = arith.constant 0 : index
      %22 = vector.load %arg8[%c0_18, %c0_19] : memref<1x64xf32, #tpu.memory_space<vmem>>, vector<1x64xf32>
      %23 = vector.broadcast %22 : vector<1x64xf32> to vector<16x64xf32>
      %24 = arith.addf %21, %23 : vector<16x64xf32>
      %25 = arith.truncf %24 : vector<16x64xf32> to vector<16x64xbf16>
      %c0_20 = arith.constant 0 : index
      %c0_21 = arith.constant 0 : index
      %26 = vector.load %arg18[%c0_20, %c0_21] : memref<16x128xbf16, #tpu.memory_space<vmem>>, vector<16x64xbf16>
      tpu.vector_store %arg18[%c0_20, %c0_21], %25 {strides = array<i32>} : memref<16x128xbf16, #tpu.memory_space<vmem>>, vector<16x64xbf16>,
      %c0_22 = arith.constant 0 : index
      %c0_23 = arith.constant 0 : index
      %c0_24 = arith.constant 0 : index
      %27 = vector.load %arg3[%c0_22, %c0_23, %c0_24] : memref<1x16x64xbf16, #tpu.memory_space<vmem>>, vector<1x16x64xbf16>
      %28 = vector.shape_cast %27 : vector<1x16x64xbf16> to vector<16x64xbf16>
      %c0_25 = arith.constant 0 : index
      %c64 = arith.constant 64 : index
      %29 = vector.load %arg18[%c0_25, %c64] : memref<16x128xbf16, #tpu.memory_space<vmem>>, vector<16x64xbf16>
      tpu.vector_store %arg18[%c0_25, %c64], %28 {strides = array<i32>} : memref<16x128xbf16, #tpu.memory_space<vmem>>, vector<16x64xbf16>,
      %c0_26 = arith.constant 0 : index
      %c0_27 = arith.constant 0 : index
      %30 = vector.load %arg18[%c0_26, %c0_27] : memref<16x128xbf16, #tpu.memory_space<vmem>>, vector<16x128xbf16>
      %c0_28 = arith.constant 0 : index
      %c0_29 = arith.constant 0 : index
      %c0_30 = arith.constant 0 : index
      %31 = vector.load %arg9[%c0_28, %c0_29, %c0_30] : memref<3x128x112xbf16, #tpu.memory_space<vmem>>, vector<1x128x112xbf16>
      %32 = vector.shape_cast %31 : vector<1x128x112xbf16> to vector<128x112xbf16>
      %cst_31 = arith.constant dense<0.000000e+00> : vector<16x112xf32>
      %33 = tpu.matmul %30, %32, %cst_31 {dimension_numbers = #tpu.dot_dimension_numbers<[1], [0], [0], [1], [0, 0, 1, 1], [], []>} : vector<16x128xbf16>, vector<128x112xbf16>, vector<16x112xf32> -> vector<16x112xf32>
      %34 = vector.extract_strided_slice %33 {offsets = [0, 0], sizes = [14, 112], strides = [1, 1]} : vector<16x112xf32> to vector<14x112xf32>
      %c1 = arith.constant 1 : index
      %c0_32 = arith.constant 0 : index
      %c0_33 = arith.constant 0 : index
      %35 = vector.load %arg9[%c1, %c0_32, %c0_33] : memref<3x128x112xbf16, #tpu.memory_space<vmem>>, vector<1x128x112xbf16>
      %36 = vector.shape_cast %35 : vector<1x128x112xbf16> to vector<128x112xbf16>
      %cst_34 = arith.constant dense<0.000000e+00> : vector<16x112xf32>
      %37 = tpu.matmul %30, %36, %cst_34 {dimension_numbers = #tpu.dot_dimension_numbers<[1], [0], [0], [1], [0, 0, 1, 1], [], []>} : vector<16x128xbf16>, vector<128x112xbf16>, vector<16x112xf32> -> vector<16x112xf32>
      %38 = vector.extract_strided_slice %37 {offsets = [1, 0], sizes = [14, 112], strides = [1, 1]} : vector<16x112xf32> to vector<14x112xf32>
      %39 = arith.addf %34, %38 : vector<14x112xf32>
      %c2 = arith.constant 2 : index
      %c0_35 = arith.constant 0 : index
      %c0_36 = arith.constant 0 : index
      %40 = vector.load %arg9[%c2, %c0_35, %c0_36] : memref<3x128x112xbf16, #tpu.memory_space<vmem>>, vector<1x128x112xbf16>
      %41 = vector.shape_cast %40 : vector<1x128x112xbf16> to vector<128x112xbf16>
      %cst_37 = arith.constant dense<0.000000e+00> : vector<16x112xf32>
      %42 = tpu.matmul %30, %41, %cst_37 {dimension_numbers = #tpu.dot_dimension_numbers<[1], [0], [0], [1], [0, 0, 1, 1], [], []>} : vector<16x128xbf16>, vector<128x112xbf16>, vector<16x112xf32> -> vector<16x112xf32>
      %43 = vector.extract_strided_slice %42 {offsets = [2, 0], sizes = [14, 112], strides = [1, 1]} : vector<16x112xf32> to vector<14x112xf32>
      %44 = arith.addf %39, %43 : vector<14x112xf32>
      %c0_38 = arith.constant 0 : index
      %c0_39 = arith.constant 0 : index
      %45 = vector.load %arg10[%c0_38, %c0_39] : memref<1x112xf32, #tpu.memory_space<vmem>>, vector<1x112xf32>
      %46 = vector.broadcast %45 : vector<1x112xf32> to vector<14x112xf32>
      %47 = arith.addf %44, %46 : vector<14x112xf32>
      %48 = arith.index_cast %arg1 : i32 to index
      %c0_40 = arith.constant 0 : index
      %c0_41 = arith.constant 0 : index
      %49 = vector.load %arg19[%48, %c0_40, %c0_41] : memref<2x14x112xf32, #tpu.memory_space<vmem>>, vector<1x14x112xf32>
      %50 = vector.shape_cast %49 : vector<1x14x112xf32> to vector<14x112xf32>
      %51 = vector.shape_cast %47 : vector<14x112xf32> to vector<1x14x112xf32>
      tpu.vector_store %arg19[%48, %c0_40, %c0_41], %51 {strides = array<i32>} : memref<2x14x112xf32, #tpu.memory_space<vmem>>, vector<1x14x112xf32>,
      %cst_42 = arith.constant dense<0.000000e+00> : vector<112xf32>
      %52 = vector.multi_reduction <add>, %47, %cst_42 [0] : vector<14x112xf32> to vector<112xf32>
      %53 = vector.shape_cast %52 : vector<112xf32> to vector<1x112xf32>
      %54 = arith.mulf %47, %47 : vector<14x112xf32>
      %cst_43 = arith.constant dense<0.000000e+00> : vector<112xf32>
      %55 = vector.multi_reduction <add>, %54, %cst_43 [0] : vector<14x112xf32> to vector<112xf32>
      %56 = vector.shape_cast %55 : vector<112xf32> to vector<1x112xf32>
      %c0_44 = arith.constant 0 : index
      %c0_45 = arith.constant 0 : index
      %57 = vector.load %arg20[%c0_44, %c0_45] : memref<1x8xf32, #tpu.memory_space<vmem>>, vector<1x8xf32>
      %c0_46 = arith.constant 0 : index
      %c0_47 = arith.constant 0 : index
      %58 = vector.load %arg13[%c0_46, %c0_47] : memref<112x8xf32, #tpu.memory_space<vmem>>, vector<112x8xf32>
      %cst_48 = arith.constant dense<0.000000e+00> : vector<1x8xf32>
      %59 = tpu.matmul %53, %58, %cst_48 {dimension_numbers = #tpu.dot_dimension_numbers<[1], [0], [0], [1], [0, 0, 1, 1], [], []>} : vector<1x112xf32>, vector<112x8xf32>, vector<1x8xf32> -> vector<1x8xf32>
      %60 = arith.addf %57, %59 : vector<1x8xf32>
      %c0_49 = arith.constant 0 : index
      %c0_50 = arith.constant 0 : index
      %61 = vector.load %arg20[%c0_49, %c0_50] : memref<1x8xf32, #tpu.memory_space<vmem>>, vector<1x8xf32>
      tpu.vector_store %arg20[%c0_49, %c0_50], %60 {strides = array<i32>} : memref<1x8xf32, #tpu.memory_space<vmem>>, vector<1x8xf32>,
      %c0_51 = arith.constant 0 : index
      %c0_52 = arith.constant 0 : index
      %62 = vector.load %arg21[%c0_51, %c0_52] : memref<1x8xf32, #tpu.memory_space<vmem>>, vector<1x8xf32>
      %c0_53 = arith.constant 0 : index
      %c0_54 = arith.constant 0 : index
      %63 = vector.load %arg13[%c0_53, %c0_54] : memref<112x8xf32, #tpu.memory_space<vmem>>, vector<112x8xf32>
      %cst_55 = arith.constant dense<0.000000e+00> : vector<1x8xf32>
      %64 = tpu.matmul %56, %63, %cst_55 {dimension_numbers = #tpu.dot_dimension_numbers<[1], [0], [0], [1], [0, 0, 1, 1], [], []>} : vector<1x112xf32>, vector<112x8xf32>, vector<1x8xf32> -> vector<1x8xf32>
      %65 = arith.addf %62, %64 : vector<1x8xf32>
      %c0_56 = arith.constant 0 : index
      %c0_57 = arith.constant 0 : index
      %66 = vector.load %arg21[%c0_56, %c0_57] : memref<1x8xf32, #tpu.memory_space<vmem>>, vector<1x8xf32>
      tpu.vector_store %arg21[%c0_56, %c0_57], %65 {strides = array<i32>} : memref<1x8xf32, #tpu.memory_space<vmem>>, vector<1x8xf32>,
    } else {
    }
    %c1_i32 = arith.constant 1 : i32
    %8 = arith.cmpi eq, %arg0, %c1_i32 : i32
    %9 = arith.extui %8 : i1 to i32
    %c0_i32_4 = arith.constant 0 : i32
    %10 = arith.cmpi ne, %9, %c0_i32_4 : i32
    scf.if %10 {
      %c0 = arith.constant 0 : index
      %c0_5 = arith.constant 0 : index
      %11 = vector.load %arg20[%c0, %c0_5] : memref<1x8xf32, #tpu.memory_space<vmem>>, vector<1x8xf32>
      %cst = arith.constant 0.00255102036 : f32
      %12 = vector.broadcast %cst : f32 to vector<1x8xf32>
      %13 = arith.mulf %11, %12 : vector<1x8xf32>
      %c0_6 = arith.constant 0 : index
      %c0_7 = arith.constant 0 : index
      %14 = vector.load %arg21[%c0_6, %c0_7] : memref<1x8xf32, #tpu.memory_space<vmem>>, vector<1x8xf32>
      %cst_8 = arith.constant 0.00255102036 : f32
      %15 = vector.broadcast %cst_8 : f32 to vector<1x8xf32>
      %16 = arith.mulf %14, %15 : vector<1x8xf32>
      %17 = arith.mulf %13, %13 : vector<1x8xf32>
      %18 = arith.subf %16, %17 : vector<1x8xf32>
      %cst_9 = arith.constant 0.000000e+00 : f32
      %19 = vector.broadcast %cst_9 : f32 to vector<1x8xf32>
      %20 = arith.maximumf %18, %19 : vector<1x8xf32>
      %cst_10 = arith.constant 9.99999974E-6 : f32
      %21 = vector.broadcast %cst_10 : f32 to vector<1x8xf32>
      %22 = arith.addf %20, %21 : vector<1x8xf32>
      %23 = math.rsqrt %22 : vector<1x8xf32>
      %c0_11 = arith.constant 0 : index
      %c0_12 = arith.constant 0 : index
      %24 = vector.load %arg11[%c0_11, %c0_12] : memref<1x8xf32, #tpu.memory_space<vmem>>, vector<1x8xf32>
      %25 = arith.mulf %23, %24 : vector<1x8xf32>
      %c0_13 = arith.constant 0 : index
      %c0_14 = arith.constant 0 : index
      %26 = vector.load %arg12[%c0_13, %c0_14] : memref<1x8xf32, #tpu.memory_space<vmem>>, vector<1x8xf32>
      %27 = arith.mulf %13, %25 : vector<1x8xf32>
      %28 = arith.subf %26, %27 : vector<1x8xf32>
      %c0_15 = arith.constant 0 : index
      %c0_16 = arith.constant 0 : index
      %29 = vector.load %arg14[%c0_15, %c0_16] : memref<8x112xf32, #tpu.memory_space<vmem>>, vector<8x112xf32>
      %cst_17 = arith.constant dense<0.000000e+00> : vector<1x112xf32>
      %30 = tpu.matmul %25, %29, %cst_17 {dimension_numbers = #tpu.dot_dimension_numbers<[1], [0], [0], [1], [0, 0, 1, 1], [], []>} : vector<1x8xf32>, vector<8x112xf32>, vector<1x112xf32> -> vector<1x112xf32>
      %c0_18 = arith.constant 0 : index
      %c0_19 = arith.constant 0 : index
      %31 = vector.load %arg14[%c0_18, %c0_19] : memref<8x112xf32, #tpu.memory_space<vmem>>, vector<8x112xf32>
      %cst_20 = arith.constant dense<0.000000e+00> : vector<1x112xf32>
      %32 = tpu.matmul %28, %31, %cst_20 {dimension_numbers = #tpu.dot_dimension_numbers<[1], [0], [0], [1], [0, 0, 1, 1], [], []>} : vector<1x8xf32>, vector<8x112xf32>, vector<1x112xf32> -> vector<1x112xf32>
      %33 = arith.index_cast %arg1 : i32 to index
      %c0_21 = arith.constant 0 : index
      %c0_22 = arith.constant 0 : index
      %34 = vector.load %arg19[%33, %c0_21, %c0_22] : memref<2x14x112xf32, #tpu.memory_space<vmem>>, vector<1x14x112xf32>
      %35 = vector.shape_cast %34 : vector<1x14x112xf32> to vector<14x112xf32>
      %36 = vector.broadcast %30 : vector<1x112xf32> to vector<14x112xf32>
      %37 = arith.mulf %35, %36 : vector<14x112xf32>
      %38 = vector.broadcast %32 : vector<1x112xf32> to vector<14x112xf32>
      %39 = arith.addf %37, %38 : vector<14x112xf32>
      %cst_23 = arith.constant 0.00999999977 : f32
      %40 = vector.broadcast %cst_23 : f32 to vector<14x112xf32>
      %41 = arith.mulf %40, %39 : vector<14x112xf32>
      %42 = arith.maximumf %39, %41 : vector<14x112xf32>
      %43 = arith.truncf %42 : vector<14x112xf32> to vector<14x112xbf16>
      %c0_24 = arith.constant 0 : index
      %c0_25 = arith.constant 0 : index
      %c0_26 = arith.constant 0 : index
      %44 = vector.load %arg15[%c0_24, %c0_25, %c0_26] : memref<3x112x48xbf16, #tpu.memory_space<vmem>>, vector<1x112x48xbf16>
      %45 = vector.shape_cast %44 : vector<1x112x48xbf16> to vector<112x48xbf16>
      %cst_27 = arith.constant dense<0.000000e+00> : vector<14x48xf32>
      %46 = tpu.matmul %43, %45, %cst_27 {dimension_numbers = #tpu.dot_dimension_numbers<[1], [0], [0], [1], [0, 0, 1, 1], [], []>} : vector<14x112xbf16>, vector<112x48xbf16>, vector<14x48xf32> -> vector<14x48xf32>
      %47 = vector.extract_strided_slice %46 {offsets = [0, 0], sizes = [12, 48], strides = [1, 1]} : vector<14x48xf32> to vector<12x48xf32>
      %c1 = arith.constant 1 : index
      %c0_28 = arith.constant 0 : index
      %c0_29 = arith.constant 0 : index
      %48 = vector.load %arg15[%c1, %c0_28, %c0_29] : memref<3x112x48xbf16, #tpu.memory_space<vmem>>, vector<1x112x48xbf16>
      %49 = vector.shape_cast %48 : vector<1x112x48xbf16> to vector<112x48xbf16>
      %cst_30 = arith.constant dense<0.000000e+00> : vector<14x48xf32>
      %50 = tpu.matmul %43, %49, %cst_30 {dimension_numbers = #tpu.dot_dimension_numbers<[1], [0], [0], [1], [0, 0, 1, 1], [], []>} : vector<14x112xbf16>, vector<112x48xbf16>, vector<14x48xf32> -> vector<14x48xf32>
      %51 = vector.extract_strided_slice %50 {offsets = [1, 0], sizes = [12, 48], strides = [1, 1]} : vector<14x48xf32> to vector<12x48xf32>
      %52 = arith.addf %47, %51 : vector<12x48xf32>
      %c2 = arith.constant 2 : index
      %c0_31 = arith.constant 0 : index
      %c0_32 = arith.constant 0 : index
      %53 = vector.load %arg15[%c2, %c0_31, %c0_32] : memref<3x112x48xbf16, #tpu.memory_space<vmem>>, vector<1x112x48xbf16>
      %54 = vector.shape_cast %53 : vector<1x112x48xbf16> to vector<112x48xbf16>
      %cst_33 = arith.constant dense<0.000000e+00> : vector<14x48xf32>
      %55 = tpu.matmul %43, %54, %cst_33 {dimension_numbers = #tpu.dot_dimension_numbers<[1], [0], [0], [1], [0, 0, 1, 1], [], []>} : vector<14x112xbf16>, vector<112x48xbf16>, vector<14x48xf32> -> vector<14x48xf32>
      %56 = vector.extract_strided_slice %55 {offsets = [2, 0], sizes = [12, 48], strides = [1, 1]} : vector<14x48xf32> to vector<12x48xf32>
      %57 = arith.addf %52, %56 : vector<12x48xf32>
      %c0_34 = arith.constant 0 : index
      %c0_35 = arith.constant 0 : index
      %58 = vector.load %arg16[%c0_34, %c0_35] : memref<1x48xf32, #tpu.memory_space<vmem>>, vector<1x48xf32>
      %59 = vector.broadcast %58 : vector<1x48xf32> to vector<12x48xf32>
      %60 = arith.addf %57, %59 : vector<12x48xf32>
      %cst_36 = arith.constant 0.00999999977 : f32
      %61 = vector.broadcast %cst_36 : f32 to vector<12x48xf32>
      %62 = arith.mulf %61, %60 : vector<12x48xf32>
      %63 = arith.maximumf %60, %62 : vector<12x48xf32>
      %64 = arith.index_cast %arg1 : i32 to index
      %c0_37 = arith.constant 0 : index
      %c0_38 = arith.constant 0 : index
      %65 = vector.load %arg17[%64, %c0_37, %c0_38] : memref<2x12x48xf32, #tpu.memory_space<vmem>>, vector<1x12x48xf32>
      %66 = vector.shape_cast %65 : vector<1x12x48xf32> to vector<12x48xf32>
      %67 = vector.shape_cast %63 : vector<12x48xf32> to vector<1x12x48xf32>
      tpu.vector_store %arg17[%64, %c0_37, %c0_38], %67 {strides = array<i32>} : memref<2x12x48xf32, #tpu.memory_space<vmem>>, vector<1x12x48xf32>,
    } else {
    }
    return
  }
  func.func @transform_0(%arg0: i32, %arg1: i32) -> (i32, i32, i32) {
    %c0_i32 = arith.constant 0 : i32
    %c0_i32_0 = arith.constant 0 : i32
    %c0_i32_1 = arith.constant 0 : i32
    return %arg1, %c0_i32, %c0_i32_0 : i32, i32, i32
  }
  func.func @transform_1(%arg0: i32, %arg1: i32) -> (i32, i32, i32) {
    %c0_i32 = arith.constant 0 : i32
    %c0_i32_0 = arith.constant 0 : i32
    %c0_i32_1 = arith.constant 0 : i32
    return %arg1, %c0_i32, %c0_i32_0 : i32, i32, i32
  }
  func.func @transform_2(%arg0: i32, %arg1: i32) -> (i32, i32) {
    %c0_i32 = arith.constant 0 : i32
    %c0_i32_0 = arith.constant 0 : i32
    %c0_i32_1 = arith.constant 0 : i32
    return %c0_i32, %c0_i32_0 : i32, i32
  }
  func.func @transform_3(%arg0: i32, %arg1: i32) -> (i32, i32) {
    %c0_i32 = arith.constant 0 : i32
    %c0_i32_0 = arith.constant 0 : i32
    %c0_i32_1 = arith.constant 0 : i32
    return %c0_i32, %c0_i32_0 : i32, i32
  }
  func.func @transform_4(%arg0: i32, %arg1: i32) -> (i32, i32) {
    %c0_i32 = arith.constant 0 : i32
    %c0_i32_0 = arith.constant 0 : i32
    %c0_i32_1 = arith.constant 0 : i32
    return %c0_i32, %c0_i32_0 : i32, i32
  }
  func.func @transform_5(%arg0: i32, %arg1: i32) -> (i32, i32) {
    %c0_i32 = arith.constant 0 : i32
    %c0_i32_0 = arith.constant 0 : i32
    %c0_i32_1 = arith.constant 0 : i32
    return %c0_i32, %c0_i32_0 : i32, i32
  }
  func.func @transform_6(%arg0: i32, %arg1: i32) -> (i32, i32) {
    %c0_i32 = arith.constant 0 : i32
    %c0_i32_0 = arith.constant 0 : i32
    %c0_i32_1 = arith.constant 0 : i32
    return %c0_i32, %c0_i32_0 : i32, i32
  }
  func.func @transform_7(%arg0: i32, %arg1: i32) -> (i32, i32, i32) {
    %c0_i32 = arith.constant 0 : i32
    %c0_i32_0 = arith.constant 0 : i32
    %c0_i32_1 = arith.constant 0 : i32
    %c0_i32_2 = arith.constant 0 : i32
    return %c0_i32, %c0_i32_0, %c0_i32_1 : i32, i32, i32
  }
  func.func @transform_8(%arg0: i32, %arg1: i32) -> (i32, i32) {
    %c0_i32 = arith.constant 0 : i32
    %c0_i32_0 = arith.constant 0 : i32
    %c0_i32_1 = arith.constant 0 : i32
    return %c0_i32, %c0_i32_0 : i32, i32
  }
  func.func @transform_9(%arg0: i32, %arg1: i32) -> (i32, i32) {
    %c0_i32 = arith.constant 0 : i32
    %c0_i32_0 = arith.constant 0 : i32
    %c0_i32_1 = arith.constant 0 : i32
    return %c0_i32, %c0_i32_0 : i32, i32
  }
  func.func @transform_10(%arg0: i32, %arg1: i32) -> (i32, i32) {
    %c0_i32 = arith.constant 0 : i32
    %c0_i32_0 = arith.constant 0 : i32
    %c0_i32_1 = arith.constant 0 : i32
    return %c0_i32, %c0_i32_0 : i32, i32
  }
  func.func @transform_11(%arg0: i32, %arg1: i32) -> (i32, i32) {
    %c0_i32 = arith.constant 0 : i32
    %c0_i32_0 = arith.constant 0 : i32
    %c0_i32_1 = arith.constant 0 : i32
    return %c0_i32, %c0_i32_0 : i32, i32
  }
  func.func @transform_12(%arg0: i32, %arg1: i32) -> (i32, i32) {
    %c0_i32 = arith.constant 0 : i32
    %c0_i32_0 = arith.constant 0 : i32
    %c0_i32_1 = arith.constant 0 : i32
    return %c0_i32, %c0_i32_0 : i32, i32
  }
  func.func @transform_13(%arg0: i32, %arg1: i32) -> (i32, i32, i32) {
    %c0_i32 = arith.constant 0 : i32
    %c0_i32_0 = arith.constant 0 : i32
    %c0_i32_1 = arith.constant 0 : i32
    %c0_i32_2 = arith.constant 0 : i32
    return %c0_i32, %c0_i32_0, %c0_i32_1 : i32, i32, i32
  }
  func.func @transform_14(%arg0: i32, %arg1: i32) -> (i32, i32) {
    %c0_i32 = arith.constant 0 : i32
    %c0_i32_0 = arith.constant 0 : i32
    %c0_i32_1 = arith.constant 0 : i32
    return %c0_i32, %c0_i32_0 : i32, i32
  }
  func.func @transform_15(%arg0: i32, %arg1: i32) -> (i32, i32, i32) {
    %c0_i32 = arith.constant 0 : i32
    %c0_i32_0 = arith.constant 0 : i32
    %c0_i32_1 = arith.constant 0 : i32
    %c0_i32_2 = arith.constant 0 : i32
    return %c0_i32, %c0_i32_0, %c0_i32_1 : i32, i32, i32
  }
}

</mosaic_0001>

<bundles_post_ra>
// kernel: tpu_custom_call.1
= control target key start
LH: loop header
LB: loop body
LE: loop exit
PB: predicated region body
PF: predicated region fallthrough
CT: control target
= control target key end

     0   :  { %s2005_s18 = smov 0   ;;  %s2007_s19 = smov 0   ;;  %s2315_s0 = inlined_call_operand.vmem [shape: bf16[2,8,64], index: 0, kind: input, shape index: {}]   ;;  %s2316_s1 = inlined_call_operand.vmem [shape: bf16[2,16,64], index: 1, kind: input, shape index: {}]   ;;  %s2317_s2 = inlined_call_operand.vmem [shape: bf16[64,64], index: 2, kind: input, shape index: {}]   ;;  %s2318_s3 = inlined_call_operand.vmem [shape: bf16[64,64], index: 3, kind: input, shape index: {}]   ;;  %s2319_s4 = inlined_call_operand.vmem [shape: f32[16,8], index: 4, kind: input, shape index: {}]   ;;  %s2320_s5 = inlined_call_operand.vmem [shape: f32[16,8], index: 5, kind: input, shape index: {}]   ;;  %s2321_s6 = inlined_call_operand.vmem [shape: f32[1,64], index: 6, kind: input, shape index: {}]   ;;  %s2322_s7 = inlined_call_operand.vmem [shape: bf16[3,128,112], index: 7, kind: input, shape index: {}]   ;;  %s2323_s8 = inlined_call_operand.vmem [shape: f32[1,112], index: 8, kind: input, shape index: {}]   ;;  %s2324_s9 = inlined_call_operand.vmem [shape: f32[1,8], index: 9, kind: input, shape index: {}]   ;;  %s2325_s10 = inlined_call_operand.vmem [shape: f32[1,8], index: 10, kind: input, shape index: {}]   ;;  %s2326_s11 = inlined_call_operand.vmem [shape: f32[112,8], index: 11, kind: input, shape index: {}]   ;;  %s2327_s12 = inlined_call_operand.vmem [shape: f32[8,112], index: 12, kind: input, shape index: {}]   ;;  %s2328_s13 = inlined_call_operand.vmem [shape: bf16[3,112,48], index: 13, kind: input, shape index: {}]   ;;  %s2329_s14 = inlined_call_operand.vmem [shape: f32[1,48], index: 14, kind: input, shape index: {}]   ;;  %s2330_s15 = inlined_call_operand.vmem [shape: f32[2,12,48], index: 15, kind: output, shape index: {}]  }
   0x1   :  { %2331 = sst [smem:[#allocation8_spill]] %s2315_s0  ;;  %s2009_s20 = smov 0  }
   0x2   :  { %s2011_s21 = smov 0   ;;  %s2013_s22 = smov 0  }
   0x3 LB: > { %s34_s23 = sadd.s32 1, %s1913_s20  ;;  %s37_s24 = sadd.s32 1, %s1917_s21  ;;  %s1921_s22 = sphi %s2013_s22, %s25_s22   ;;  %s1917_s21 = sphi %s2011_s21, %s2340_s21   ;;  %s1913_s20 = sphi %s2009_s20, %s2339_s20   ;;  %s1909_s19 = sphi %s2007_s19, %s2338_s19   ;;  %s1905_s18 = sphi %s2005_s18, %s2337_s18  }
   0x4   : > { %p35_p0 = scmp.ge.s32.totalorder %s34_s23, 2  ;;  %p1482_p1 = scmp.ge.s32.totalorder %s1921_s22, 1 }
   0x5   : > { %p453_p2 = scmp.lt.s32.totalorder %s1921_s22, 5 }
   0x6   : > { %s2342_s23 = smov (%p35_p0, %s34_s23), 0  ;;  %s2344_s24 = smov (!%p35_p0, %s37_s24), %s1917_s21 }
   0x7   : > { %2332 = sst [smem:[#allocation6_spill]] %s2342_s23  ;;  %p454_p3 = pnand %p1482_p1, %p453_p2 }
   0x8   : > { %p39_p4 = scmp.ge.s32.totalorder %s2344_s24, 2  ;;  %p500_p5 = scmp.lt.s32.totalorder (!%p454_p3), %s1905_s18, 1 }
   0x9   : > { %457 = sbr.rel (%p454_p3) target bundleno = 982 (0x3d6), region = 80  ;;  %p510_p6 = scmp.eq.s32.totalorder (!%p454_p3), %s1909_s19, 0 }
   0xa   : > { %s2346_s24 = smov (%p39_p4, %s2344_s24), 0  ;;  %p511_p7 = scmp.eq.s32.totalorder (!%p454_p3), %s1905_s18, 0 }
   0xb   : > { %2333 = sst [smem:[#allocation7_spill]] %s2346_s24 }
   0xc   : > { %p512_p8 = pnand (!%p454_p3), %p511_p7, %p510_p6  ;;  %s2334_s0 = sld [smem:[#allocation8_spill]] (!%p454_p3) }
   0xe   : > { %s501_s25 = scalar_select %p500_p5, %s1905_s18, 1 }
   0xf   : > { %515 = sbr.rel (%p512_p8) target bundleno = 23 (0x17), region = 84 }
  0x10   : > { %s1483_s26 = sshll.u32 %s501_s25, 2  ;;  %s1781_s27 = sshll.u32 %s501_s25, 3 }
  0x11   : > { %s2049_s24 = scalar_lea.vmem %s2316_s1, %s1781_s27 }
  0x12   : > { %s503_s30 = scalar_lea.vmem %s2334_s0, %s1483_s26 }
  0x14   : > { %vm516_vm0 = vcmask 57344   ;;  %v1923_v0 = vmov 0.0  }
  0x15   : > { %517 = vst.msk [vmem:[#allocation4] sm:$0x1] %vm516_vm0, %v1923_v0 }
  0x16   : > { %518 = vst.msk [vmem:[#allocation5] sm:$0x1] %vm516_vm0, %v1923_v0 }
  0x17 PF: > { %p1486_p9 = scmp.ne.s32.totalorder %s1909_s19, 0 }
  0x18   : > { %s1924_s0 = smov (!%p1486_p9), 64   ;;  %s1657_s17 = sshll.u32 (!%p1486_p9), %s1905_s18, 4 }
  0x19   : > { %521 = sbr.rel (%p1486_p9) target bundleno = 646 (0x286), region = 88  ;;  %s975_s23 = scalar_lea.vmem (!%p1486_p9), [#allocation3], %s1657_s17 }
  0x1e   : > { %v1785_v1 = vld [vmem:[%s2317_s2 + $0x18] sm:$0xff]  ;;  %v1784_v3 = vld [vmem:[%s2317_s2 + $0x10] sm:$0xff]  ;;  %v1783_v5 = vld [vmem:[%s2317_s2 + $0x8] sm:$0xff]  ;;  %vm555_vm1 = vcmask 523264   ;;  %vm621_vm2 = vcmask 64512   ;;  %vm688_vm3 = vcmask 519168  }
  0x1f   : > { %v1789_v2 = vld [vmem:[%s2318_s3 + $0x18] sm:$0xff]  ;;  %563 = vmatpush.bf16.msra.mxu0 %v1785_v1  ;;  %v1788_v4 = vld [vmem:[%s2318_s3 + $0x10] sm:$0xff]  ;;  %v1787_v6 = vld [vmem:[%s2318_s3 + $0x8] sm:$0xff]  ;;  %vm701_vm4 = vcmask 1043968   ;;  %vm871_vm5 = vcmask 1046528   ;;  %vm960_vm6 = vcmask 1045504  }
  0x20   : > { %608 = vmatpush.bf16.msra.mxu1 %v1789_v2  ;;  %v1782_v7 = vld [vmem:[%s2317_s2] sm:$0xff]  ;;  %v620_v15 = vld [vmem:[%s2320_s5 + $0x8] sm:$0xff]  ;;  %v1798_v20 = vld [vmem:[%s2322_s7 + $0x38] sm:$0xff]  ;;  %vm978_vm7 = vcmask 914432   ;;  %vm976_vm8 = vcmask 916480   ;;  %vm1039_vm9 = vcmask 57344  }
  0x21   : > { %v1786_v8 = vld [vmem:[%s2318_s3] sm:$0xff]  ;;  %v618_v19 = vld [vmem:[%s2319_s4 + $0x8] sm:$0xff]  ;;  %v1806_v21 = vld [vmem:[%s2322_s7 + $0x78] sm:$0xff]  ;;  %776 = vmatpush.bf16.msra.mxu2 %v1798_v20 }
  0x22   : > { %v522_v9 = vld [vmem:[%s503_s30] sm:$0xf]  ;;  %v692_v14 = vld [vmem:[%s2049_s24 + $0x4] sm:$0xf]  ;;  %v1814_v22 = vld [vmem:[%s2322_s7 + $0xb8] sm:$0xff] }
  0x23   : > { %564 = vmatpush.bf16.msra.mxu0 %v1784_v3  ;;  %v691_v10 = vld [vmem:[%s2049_s24] sm:$0xf]  ;;  %v1797_v23 = vld [vmem:[%s2322_s7 + $0x30] sm:$0xff]  ;;  %v1796_v26 = vld [vmem:[%s2322_s7 + $0x28] sm:$0xff] }
  0x24   : > { %609 = vmatpush.bf16.msra.mxu1 %v1788_v4  ;;  %695 = vrot.lane.b32.xlu0 %v691_v10, %s1924_s0  ;;  %v619_v11 = vld [vmem:[%s2320_s5] sm:$0xff]  ;;  %v1805_v24 = vld [vmem:[%s2322_s7 + $0x70] sm:$0xff]  ;;  %v1804_v27 = vld [vmem:[%s2322_s7 + $0x68] sm:$0xff] }
  0x25   : > { %v617_v18 = vld [vmem:[%s2319_s4] sm:$0xff]  ;;  %v1813_v25 = vld [vmem:[%s2322_s7 + $0xb0] sm:$0xff]  ;;  %777 = vmatpush.bf16.msra.mxu2 %v1797_v23  ;;  %v1812_v28 = vld [vmem:[%s2322_s7 + $0xa8] sm:$0xff] }
  0x26   : > { %v1795_v29 = vld [vmem:[%s2322_s7 + $0x20] sm:$0xff]  ;;  %v1794_v32 = vld [vmem:[%s2322_s7 + $0x18] sm:$0xff]  ;;  %v1793_v35 = vld [vmem:[%s2322_s7 + $0x10] sm:$0xff] }
  0x27   : > { %565 = vmatpush.bf16.msra.mxu0 %v1783_v5  ;;  %v1803_v30 = vld [vmem:[%s2322_s7 + $0x60] sm:$0xff]  ;;  %v1802_v33 = vld [vmem:[%s2322_s7 + $0x58] sm:$0xff]  ;;  %v1801_v36 = vld [vmem:[%s2322_s7 + $0x50] sm:$0xff] }
  0x28   : > { %610 = vmatpush.bf16.msra.mxu1 %v1787_v6  ;;  %v1811_v31 = vld [vmem:[%s2322_s7 + $0xa0] sm:$0xff]  ;;  %v1810_v34 = vld [vmem:[%s2322_s7 + $0x98] sm:$0xff]  ;;  %v1809_v37 = vld [vmem:[%s2322_s7 + $0x90] sm:$0xff] }
  0x29   : > { %778 = vmatpush.bf16.msra.mxu2 %v1796_v26  ;;  %v1792_v39 = vld [vmem:[%s2322_s7 + $0x8] sm:$0xff]  ;;  %v1791_v42 = vld [vmem:[%s2322_s7] sm:$0xff]  ;;  %v1012_v60 = vld [vmem:[%s2326_s11 + $0x58] sm:$0xff] }
  0x2a   : > { %v1800_v40 = vld [vmem:[%s2322_s7 + $0x48] sm:$0xff]  ;;  %v1799_v43 = vld [vmem:[%s2322_s7 + $0x40] sm:$0xff]  ;;  %v1011_v61 = vld [vmem:[%s2326_s11 + $0x50] sm:$0xff] }
  0x2b   : > { %566 = vmatpush.bf16.msra.mxu0 %v1782_v7  ;;  %v1808_v41 = vld [vmem:[%s2322_s7 + $0x88] sm:$0xff]  ;;  %v1807_v44 = vld [vmem:[%s2322_s7 + $0x80] sm:$0xff]  ;;  %v1008_v0 = vld [vmem:[%s2326_s11 + $0x38] sm:$0xff] }
  0x2c   : > { %611 = vmatpush.bf16.msra.mxu1 %v1786_v8  ;;  %697 = vrot.lane.b32.xlu0 %v692_v14, %s1924_s0  ;;  %v1878_v46 = vld [vmem:[%s2321_s6] ss:$0 sm:$0xff]  ;;  %v1014_v58 = vld [vmem:[%s2326_s11 + $0x68] sm:$0xff]  ;;  %v1007_v1 = vld [vmem:[%s2326_s11 + $0x30] sm:$0xff] }
  0x2d   : > { %779 = vmatpush.bf16.msra.mxu2 %v1795_v29  ;;  %v1013_v59 = vld [vmem:[%s2326_s11 + $0x60] sm:$0xff]  ;;  %v1010_v62 = vld [vmem:[%s2326_s11 + $0x48] sm:$0xff]  ;;  %v1004_v4 = vld [vmem:[%s2326_s11 + $0x18] sm:$0xff] }
  0x2e   : > { %1503 = vmatmul.msk.bf16.vlgmr.msra.gmra.mxu0 %vm555_vm1, %v522_v9  ;;  %v1009_v63 = vld [vmem:[%s2326_s11 + $0x40] sm:$0xff]  ;;  %v1006_v2 = vld [vmem:[%s2326_s11 + $0x28] sm:$0xff]  ;;  %v1003_v5 = vld [vmem:[%s2326_s11 + $0x10] sm:$0xff] }
  0x2f   : > { %1520 = vmatmul.msk.bf16.vlgmr.msra.gmra.mxu1 %vm555_vm1, %v522_v9  ;;  %944 = vmatpush.bf16.msrb.mxu0 %v1814_v22  ;;  %v1005_v3 = vld [vmem:[%s2326_s11 + $0x20] sm:$0xff]  ;;  %v1002_v7 = vld [vmem:[%s2326_s11 + $0x8] sm:$0xff] }
  0x30   : > { %1020 = vmatpush.msrb.mxu1 %v1014_v58  ;;  %v1001_v8 = vld [vmem:[%s2326_s11] sm:$0xff] }
  0x31   : > { %780 = vmatpush.bf16.msra.mxu2 %v1794_v32  ;;  %v1879_v20 = vld [vmem:[%s2323_s8] ss:$0 sm:$0xff] }
  0x32   : > { %1021 = vmatpush.msrb.mxu1 %v1013_v59 }
  0x33   : > { %945 = vmatpush.bf16.msrb.mxu0 %v1813_v25 }
  0x34   : > { %1022 = vmatpush.msrb.mxu1 %v1012_v60 }
  0x35   : > { %781 = vmatpush.bf16.msra.mxu2 %v1793_v35 }
  0x36   : > { %1023 = vmatpush.msrb.mxu1 %v1011_v61 }
  0x37   : > { %946 = vmatpush.bf16.msrb.mxu0 %v1812_v28 }
  0x38   : > { %1024 = vmatpush.msrb.mxu1 %v1010_v62 }
  0x39   : > { %782 = vmatpush.bf16.msra.mxu2 %v1792_v39 }
  0x3a   : > { %1025 = vmatpush.msrb.mxu1 %v1009_v63 }
  0x3b   : > { %947 = vmatpush.bf16.msrb.mxu0 %v1811_v31 }
  0x3c   : > { %1026 = vmatpush.msrb.mxu1 %v1008_v0 }
  0x3d   : > { %783 = vmatpush.bf16.msra.mxu2 %v1791_v42 }
  0x3e   : > { %1027 = vmatpush.msrb.mxu1 %v1007_v1 }
  0x3f   : > { %948 = vmatpush.bf16.msrb.mxu0 %v1810_v34 }
  0x40   : > { %1028 = vmatpush.msrb.mxu1 %v1006_v2 }
  0x41   : > { %1061 = vmatpush.msrb.mxu2 %v1014_v58 }
  0x42   : > { %1029 = vmatpush.msrb.mxu1 %v1005_v3 }
  0x43   : > { %949 = vmatpush.bf16.msrb.mxu0 %v1809_v37  ;;  %1062 = vmatpush.msrb.mxu2 %v1013_v59 }
  0x44   : > { %1030 = vmatpush.msrb.mxu1 %v1004_v4 }
  0x45   : > { %1063 = vmatpush.msrb.mxu2 %v1012_v60 }
  0x46   : > { %1031 = vmatpush.msrb.mxu1 %v1003_v5 }
  0x47   : > { %950 = vmatpush.bf16.msrb.mxu0 %v1808_v41  ;;  %1064 = vmatpush.msrb.mxu2 %v1011_v61 }
  0x48   : > { %1032 = vmatpush.msrb.mxu1 %v1002_v7 }
  0x49   : > { %1065 = vmatpush.msrb.mxu2 %v1010_v62 }
  0x4a   : > { %1033 = vmatpush.msrb.mxu1 %v1001_v8 }
  0x4b   : > { %951 = vmatpush.bf16.msrb.mxu0 %v1807_v44  ;;  %1066 = vmatpush.msrb.mxu2 %v1009_v63 }
  0x4d   : > { %1067 = vmatpush.msrb.mxu2 %v1008_v0 }
  0x4f   : > { %1068 = vmatpush.msrb.mxu2 %v1007_v1 }
  0x51   : > { %1069 = vmatpush.msrb.mxu2 %v1006_v2 }
  0x53   : > { %1070 = vmatpush.msrb.mxu2 %v1005_v3 }
  0x55   : > { %1071 = vmatpush.msrb.mxu2 %v1004_v4 }
  0x57   : > { %1072 = vmatpush.msrb.mxu2 %v1003_v5 }
  0x59   : > { %1073 = vmatpush.msrb.mxu2 %v1002_v7 }
  0x5b   : > { %1074 = vmatpush.msrb.mxu2 %v1001_v8 }
  0x96   : > { %v696_v50 = vpop.permute.xlu0 %695 }
  0x9e   : > { %v698_v56 = vpop.permute.xlu0 %697 }
  0xab   : > { %v568_v12 = vpop.f32.mrf.mxu0 }
  0xac   : > { %v613_v13 = vpop.f32.mrf.mxu1 }
  0xad   : > { %643 = vmatpush.msra.mxu3 %v613_v13 }
  0xae   : > { %1521 = vmatmul.msk.f32.vlgmr.msra.gmra.mxu3 %vm621_vm2, %v619_v11 }
  0xaf   : > { %672 = vmatpush.msrb.mxu3 %v568_v12 }
  0xb1   : > { %855 = vmatpush.bf16.msra.mxu3 %v1806_v21 }
  0xb3   : > { %v570_v16 = vpop.f32.mrf.mxu0 }
  0xb4   : > { %v615_v17 = vpop.f32.mrf.mxu1 }
  0xb5   : > { %856 = vmatpush.bf16.msra.mxu3 %v1805_v24 }
  0xb6   : > { %1522 = vmatmul.msk.f32.gmra.mxu3 %vm621_vm2, %v620_v15 }
  0xb9   : > { %857 = vmatpush.bf16.msra.mxu3 %v1804_v27 }
  0xbd   : > { %858 = vmatpush.bf16.msra.mxu3 %v1803_v30 }
  0xbe   : > { %1523 = vmatmul.msk.f32.vlgmr.msrb.gmra.mxu3 %vm621_vm2, %v617_v18 }
  0xc1   : > { %859 = vmatpush.bf16.msra.mxu3 %v1802_v33 }
  0xc5   : > { %860 = vmatpush.bf16.msra.mxu3 %v1801_v36 }
  0xc6   : > { %1524 = vmatmul.msk.f32.gmra.mxu3 %vm621_vm2, %v618_v19 }
  0xc9   : > { %861 = vmatpush.bf16.msra.mxu3 %v1800_v40 }
  0xcd   : > { %862 = vmatpush.bf16.msra.mxu3 %v1799_v43 }
 0x131   : > { %v645_v38 = vpop.f32.mrf.mxu3 }
 0x139   : > { %v648_v45 = vpop.f32.mrf.mxu3 }
 0x141   : > { %v674_v47 = vpop.f32.mrf.mxu3 }
 0x142   : > { %v675_v48 = vadd.f32 %v674_v47, %v645_v38  ;;  %v1000_v47 = vld [vmem:[#allocation4] sm:$0x1] }
 0x144   : > { %v684_v49 = vadd.f32 %v1878_v46, %v675_v48 }
 0x146   : > { %v686_v51 = vpack.c.bf16 %v684_v49, %v684_v49 }
 0x148   : > { %689 = vst.msk [vmem:[#allocation2] sm:$0xf] %vm688_vm3, %v686_v51 }
 0x149   : > { %702 = vst.msk [vmem:[#allocation2] sm:$0xf] %vm701_vm4, %v696_v50  ;;  %v677_v52 = vpop.f32.mrf.mxu3  ;;  %v1041_v50 = vld [vmem:[#allocation5] sm:$0x1] }
 0x14a   : > { %v678_v53 = vadd.f32 %v677_v52, %v648_v45 }
 0x14c   : > { %v685_v54 = vadd.f32 %v1878_v46, %v678_v53 }
 0x14e   : > { %v687_v55 = vpack.c.bf16 %v685_v54, %v685_v54 }
 0x150   : > { %690 = vst.msk [vmem:[#allocation2 + $0x4] sm:$0xf] %vm688_vm3, %v687_v55 }
 0x151   : > { %703 = vst.msk [vmem:[#allocation2 + $0x4] sm:$0xf] %vm701_vm4, %v698_v56 }
 0x158   : > { %v1790_v57 = vld [vmem:[#allocation2] sm:$0xff] }
 0x159   : > { %784 = vmatmul.bf16.vlgmr.msra.gmra.mxu2 %v1790_v57  ;;  %863 = vmatmul.bf16.vlgmr.msra.gmra.mxu3 %v1790_v57 }
 0x15a   : > { %952 = vmatmul.bf16.vlgmr.msrb.gmra.mxu0 %v1790_v57 }
 0x1d7   : > { %v953_v6 = vpop.f32.mrf.mxu0 }
 0x1d8   : > { %v961_v17 = vrot.slane %v953_v6, 2 }
 0x1dc   : > { %v785_v9 = vpop.f32.mrf.mxu2  ;;  %v864_v10 = vpop.f32.mrf.mxu3 }
 0x1dd   : > { %v872_v13 = vrot.slane %v864_v10, 1 }
 0x1df   : > { %v955_v11 = vpop.f32.mrf.mxu0 }
 0x1e0   : > { %v962_v14 = vrot.slane %v955_v11, 2 }
 0x1e2   : > { %v963_v22 = vsel %vm960_vm6, %v961_v17, %v962_v14 }
 0x1e4   : > { %v866_v12 = vpop.f32.mrf.mxu3  ;;  %v787_v16 = vpop.f32.mrf.mxu2 }
 0x1e5   : > { %v873_v15 = vrot.slane %v866_v12, 1 }
 0x1e7   : > { %v874_v18 = vsel %vm871_vm5, %v872_v13, %v873_v15  ;;  %v878_v19 = vadd.f32 %v873_v15, %v787_v16 }
 0x1e8   : > { %v877_v21 = vadd.f32 %v874_v18, %v785_v9 }
 0x1e9   : > { %v967_v23 = vadd.f32 %v962_v14, %v878_v19 }
 0x1ea   : > { %v966_v24 = vadd.f32 %v963_v22, %v877_v21 }
 0x1eb   : > { %v973_v25 = vadd.f32 %v1879_v20, %v967_v23 }
 0x1ec   : > { %v972_v26 = vadd.f32 %v1879_v20, %v966_v24 }
 0x1ed   : > { %979 = vst.msk [vmem:[%s975_s23 + $0x8] sm:$0x3f] %vm978_vm7, %v973_v25  ;;  %v981_v27 = vsel %vm978_vm7, %v973_v25, 0.0  ;;  %v990_v28 = vmul.f32 %v973_v25, %v973_v25 }
 0x1ee   : > { %v989_v29 = vmul.f32 %v972_v26, %v972_v26  ;;  %977 = vst.msk [vmem:[%s975_s23] sm:$0xff] %vm976_vm8, %v972_v26  ;;  %v980_v30 = vsel %vm976_vm8, %v972_v26, 0.0 }
 0x1ef   : > { %v992_v31 = vsel %vm978_vm7, %v990_v28, 0.0  ;;  %v982_v32 = vadd.f32 %v981_v27, %v980_v30 }
 0x1f0   : > { %v991_v33 = vsel %vm976_vm8, %v989_v29, 0.0 }
 0x1f1   : > { %v983_v34 = vrot.slane %v982_v32, 4  ;;  %v993_v35 = vadd.f32 %v992_v31, %v991_v33 }
 0x1f3   : > { %v984_v36 = vadd.f32 %v983_v34, %v982_v32  ;;  %v994_v37 = vrot.slane %v993_v35, 4 }
 0x1f5   : > { %v985_v38 = vrot.slane %v984_v36, 2  ;;  %v995_v39 = vadd.f32 %v994_v37, %v993_v35 }
 0x1f7   : > { %v986_v40 = vadd.f32 %v985_v38, %v984_v36  ;;  %v996_v41 = vrot.slane %v995_v39, 2 }
 0x1f9   : > { %v987_v42 = vrot.slane %v986_v40, 1  ;;  %v997_v43 = vadd.f32 %v996_v41, %v995_v39 }
 0x1fb   : > { %v988_v44 = vadd.f32 %v987_v42, %v986_v40  ;;  %v998_v45 = vrot.slane %v997_v43, 1 }
 0x1fd   : > { %1658 = vmatmul.msk.f32.vlgmr.msrb.gmra.mxu1 %vm976_vm8, %v988_v44  ;;  %v999_v46 = vadd.f32 %v998_v45, %v997_v43 }
 0x1ff   : > { %1659 = vmatmul.msk.f32.vlgmr.msrb.gmra.mxu2 %vm976_vm8, %v999_v46 }
 0x27a   : > { %v1035_v48 = vpop.f32.mrf.mxu1 }
 0x27b   : > { %v1038_v49 = vadd.f32 %v1035_v48, %v1000_v47 }
 0x27d   : > { %1040 = vst.msk [vmem:[#allocation4] sm:$0x1] %vm1039_vm9, %v1038_v49 }
 0x282   : > { %v1076_v51 = vpop.f32.mrf.mxu2 }
 0x283   : > { %v1079_v52 = vadd.f32 %v1076_v51, %v1041_v50 }
 0x285   : > { %1080 = vst.msk [vmem:[#allocation5] sm:$0x1] %vm1039_vm9, %v1079_v52 }
 0x286 PF: > { %p1660_p10 = scmp.ne.s32.totalorder %s1909_s19, 1 }
 0x287   : > { %s1663_s25 = sshll.u32 (!%p1660_p10), %s1905_s18, 4 }
 0x288   : > { %1084 = sbr.rel (%p1660_p10) target bundleno = 982 (0x3d6), region = 92  ;;  %s1157_s30 = scalar_lea.vmem (!%p1660_p10), [#allocation3], %s1663_s25 }
 0x289   : > { %s1417_s29 = scalar_lea.vmem (!%p1660_p10), %s2330_s15, %s1663_s25 }
 0x28d   : > { %v1108_v53 = vld [vmem:[%s2327_s12] sm:$0xff]  ;;  %v1085_v54 = vld [vmem:[#allocation4] sm:$0x1]  ;;  %v1087_v55 = vld [vmem:[#allocation5] sm:$0x1]  ;;  %vm1109_vm13 = vcmask 64512  }
 0x28e   : > { %1128 = vmatpush.msra.mxu1 %v1108_v53  ;;  %v1086_v56 = vmul.f32 0.0025510204, %v1085_v54  ;;  %v1088_v57 = vmul.f32 0.0025510204, %v1087_v55  ;;  %v1821_v61 = vld [vmem:[%s2328_s13 + $0x30] sm:$0xff]  ;;  %v1828_v62 = vld [vmem:[%s2328_s13 + $0x68] sm:$0xff] }
 0x28f   : > { %v1835_v63 = vld [vmem:[%s2328_s13 + $0xa0] sm:$0xff]  ;;  %1232 = vmatpush.bf16.msra.mxu2 %v1821_v61  ;;  %1303 = vmatpush.bf16.msra.mxu3 %v1828_v62  ;;  %v1820_v1 = vld [vmem:[%s2328_s13 + $0x28] sm:$0xff]  ;;  %v1834_v3 = vld [vmem:[%s2328_s13 + $0x98] sm:$0xff]  ;;  %vm1227_vm14 = vcmask 916480   ;;  %vm1318_vm15 = vcmask 1046528   ;;  %vm1399_vm0 = vcmask 1045504  }
 0x290   : > { %1151 = vmatpush.msrb.mxu1 %v1108_v53  ;;  %v1089_v58 = vmul.f32 %v1086_v56, %v1086_v56  ;;  %v1827_v2 = vld [vmem:[%s2328_s13 + $0x60] sm:$0xff]  ;;  %1384 = vmatpush.bf16.msra.mxu0 %v1835_v63  ;;  %v1826_v17 = vld [vmem:[%s2328_s13 + $0x58] sm:$0xff]  ;;  %v1833_v18 = vld [vmem:[%s2328_s13 + $0x90] sm:$0xff]  ;;  %vm1420_vm1 = vcmask 388096   ;;  %vm1418_vm2 = vcmask 392192  }
 0x291   : > { %v1103_v10 = vld [vmem:[%s2324_s9] sm:$0x1]  ;;  %v1818_v19 = vld [vmem:[%s2328_s13 + $0x18] sm:$0xff]  ;;  %v1825_v20 = vld [vmem:[%s2328_s13 + $0x50] sm:$0xff] }
 0x292   : > { %v1090_v59 = vsub.f32 %v1088_v57, %v1089_v58  ;;  %v1105_v14 = vld [vmem:[%s2325_s10] sm:$0x1]  ;;  %v1832_v21 = vld [vmem:[%s2328_s13 + $0x88] sm:$0xff]  ;;  %v1817_v22 = vld [vmem:[%s2328_s13 + $0x10] sm:$0xff] }
 0x293   : > { %1233 = vmatpush.bf16.msra.mxu2 %v1820_v1  ;;  %1304 = vmatpush.bf16.msra.mxu3 %v1827_v2  ;;  %v1819_v16 = vld [vmem:[%s2328_s13 + $0x20] sm:$0xff]  ;;  %v1824_v23 = vld [vmem:[%s2328_s13 + $0x48] sm:$0xff]  ;;  %v1830_v27 = vld [vmem:[%s2328_s13 + $0x78] sm:$0xff] }
 0x294   : > { %v1091_v60 = vmax.f32 %v1090_v59, 0.0  ;;  %1385 = vmatpush.bf16.msra.mxu0 %v1834_v3  ;;  %v1831_v24 = vld [vmem:[%s2328_s13 + $0x80] sm:$0xff]  ;;  %v1816_v25 = vld [vmem:[%s2328_s13 + $0x8] sm:$0xff]  ;;  %v1822_v29 = vld [vmem:[%s2328_s13 + $0x38] sm:$0xff] }
 0x295   : > { %v1823_v26 = vld [vmem:[%s2328_s13 + $0x40] sm:$0xff]  ;;  %v1829_v30 = vld [vmem:[%s2328_s13 + $0x70] sm:$0xff]  ;;  %v1159_v34 = vld [vmem:[%s1157_s30 + $0x8] sm:$0x3f] }
 0x296   : > { %v1092_v0 = vadd.f32 1e-05, %v1091_v60  ;;  %v1815_v28 = vld [vmem:[%s2328_s13] sm:$0xff] }
 0x297   : > { %1234 = vmatpush.bf16.msra.mxu2 %v1819_v16  ;;  %1305 = vmatpush.bf16.msra.mxu3 %v1826_v17  ;;  %v1158_v33 = vld [vmem:[%s1157_s30] sm:$0xff] }
 0x298   : > { %1881 = vrsqrt.f32 %v1092_v0  ;;  %vm1099_vm10 = vweird.f32 %v1092_v0  ;;  %1386 = vmatpush.bf16.msra.mxu0 %v1833_v18  ;;  %v1880_v58 = vld [vmem:[%s2329_s14] ss:$0 sm:$0xff] }
 0x29b   : > { %1235 = vmatpush.bf16.msra.mxu2 %v1818_v19  ;;  %1306 = vmatpush.bf16.msra.mxu3 %v1825_v20 }
 0x29c   : > { %1387 = vmatpush.bf16.msra.mxu0 %v1832_v21 }
 0x29e   : > { %v1882_v4 = vpop.eup %1881 }
 0x29f   : > { %v1094_v5 = vmul.f32 %v1882_v4, %v1092_v0  ;;  %vm1100_vm11 = vweird.f32 %v1882_v4  ;;  %1236 = vmatpush.bf16.msra.mxu2 %v1817_v22  ;;  %1307 = vmatpush.bf16.msra.mxu3 %v1824_v23 }
 0x2a0   : > { %vm1101_vm12 = vmor %vm1099_vm10, %vm1100_vm11  ;;  %1388 = vmatpush.bf16.msra.mxu0 %v1831_v24 }
 0x2a1   : > { %v1095_v6 = vmul.f32 %v1882_v4, %v1094_v5 }
 0x2a3   : > { %v1096_v7 = vmul.f32 0.5, %v1095_v6  ;;  %1237 = vmatpush.bf16.msra.mxu2 %v1816_v25  ;;  %1308 = vmatpush.bf16.msra.mxu3 %v1823_v26 }
 0x2a4   : > { %1389 = vmatpush.bf16.msra.mxu0 %v1830_v27 }
 0x2a5   : > { %v1097_v8 = vsub.f32 1.5, %v1096_v7 }
 0x2a7   : > { %v1098_v9 = vmul.f32 %v1882_v4, %v1097_v8  ;;  %1238 = vmatpush.bf16.msra.mxu2 %v1815_v28  ;;  %1309 = vmatpush.bf16.msra.mxu3 %v1822_v29 }
 0x2a8   : > { %1390 = vmatpush.bf16.msra.mxu0 %v1829_v30 }
 0x2a9   : > { %v1102_v11 = vsel %vm1101_vm12, %v1882_v4, %v1098_v9 }
 0x2aa   : > { %v1104_v12 = vmul.f32 %v1103_v10, %v1102_v11 }
 0x2ac   : > { %v1106_v13 = vmul.f32 %v1104_v12, %v1086_v56  ;;  %1661 = vmatmul.msk.f32.vlgmr.msra.gmra.mxu1 %vm1109_vm13, %v1104_v12 }
 0x2ae   : > { %v1107_v15 = vsub.f32 %v1105_v14, %v1106_v13 }
 0x2b4   : > { %1662 = vmatmul.msk.f32.vlgmr.msrb.gmra.mxu1 %vm1109_vm13, %v1107_v15 }
 0x329   : > { %v1130_v31 = vpop.f32.mrf.mxu1 }
 0x32a   : > { %v1160_v32 = vperm.slane %v1130_v31, 0 }
 0x32c   : > { %v1161_v36 = vmul.f32 %v1160_v32, %v1158_v33  ;;  %v1162_v37 = vmul.f32 %v1160_v32, %v1159_v34 }
 0x331   : > { %v1153_v35 = vpop.f32.mrf.mxu1 }
 0x332   : > { %v1163_v38 = vperm.slane %v1153_v35, 0 }
 0x334   : > { %v1164_v39 = vadd.f32 %v1163_v38, %v1161_v36  ;;  %v1165_v40 = vadd.f32 %v1163_v38, %v1162_v37 }
 0x336   : > { %v1166_v41 = vmul.f32 0.01, %v1164_v39  ;;  %v1167_v42 = vmul.f32 0.01, %v1165_v40 }
 0x338   : > { %v1168_v43 = vmax.f32 %v1164_v39, %v1166_v41  ;;  %v1169_v44 = vmax.f32 %v1165_v40, %v1167_v42 }
 0x33a   : > { %v1170_v45 = vpack.c.bf16 %v1169_v44, %v1168_v43 }
 0x33c   : > { %1692 = vmatmul.msk.bf16.vlgmr.msra.gmra.mxu2 %vm1227_vm14, %v1170_v45  ;;  %1735 = vmatmul.msk.bf16.vlgmr.msra.gmra.mxu3 %vm1227_vm14, %v1170_v45 }
 0x33d   : > { %1778 = vmatmul.msk.bf16.vlgmr.msra.gmra.mxu0 %vm1227_vm14, %v1170_v45 }
 0x3ba   : > { %v1392_v46 = vpop.f32.mrf.mxu0 }
 0x3bb   : > { %v1400_v55 = vrot.slane %v1392_v46, 2 }
 0x3bf   : > { %v1240_v47 = vpop.f32.mrf.mxu2  ;;  %v1311_v48 = vpop.f32.mrf.mxu3 }
 0x3c0   : > { %v1319_v51 = vrot.slane %v1311_v48, 1 }
 0x3c2   : > { %v1394_v49 = vpop.f32.mrf.mxu0 }
 0x3c3   : > { %v1401_v52 = vrot.slane %v1394_v49, 2 }
 0x3c5   : > { %v1402_v60 = vsel %vm1399_vm0, %v1400_v55, %v1401_v52 }
 0x3c7   : > { %v1313_v50 = vpop.f32.mrf.mxu3  ;;  %v1242_v54 = vpop.f32.mrf.mxu2 }
 0x3c8   : > { %v1320_v53 = vrot.slane %v1313_v50, 1 }
 0x3ca   : > { %v1321_v56 = vsel %vm1318_vm15, %v1319_v51, %v1320_v53  ;;  %v1325_v57 = vadd.f32 %v1320_v53, %v1242_v54 }
 0x3cb   : > { %v1324_v59 = vadd.f32 %v1321_v56, %v1240_v47 }
 0x3cc   : > { %v1406_v61 = vadd.f32 %v1401_v52, %v1325_v57 }
 0x3cd   : > { %v1405_v62 = vadd.f32 %v1402_v60, %v1324_v59 }
 0x3ce   : > { %v1412_v63 = vadd.f32 %v1880_v58, %v1406_v61 }
 0x3cf   : > { %v1411_v0 = vadd.f32 %v1880_v58, %v1405_v62 }
 0x3d0   : > { %v1414_v1 = vmul.f32 0.01, %v1412_v63 }
 0x3d1   : > { %v1413_v2 = vmul.f32 0.01, %v1411_v0 }
 0x3d2   : > { %v1416_v3 = vmax.f32 %v1412_v63, %v1414_v1 }
 0x3d3   : > { %v1415_v4 = vmax.f32 %v1411_v0, %v1413_v2 }
 0x3d4   : > { %1421 = vst.msk [vmem:[%s1417_s29 + $0x8] sm:$0xf] %vm1420_vm1, %v1416_v3 }
 0x3d5   : > { %1419 = vst.msk [vmem:[%s1417_s29] sm:$0xff] %vm1418_vm2, %v1415_v4 }
 0x3d6 PF: > { %s25_s22 = sadd.s32 1, %s1921_s22   ;;  %s2335_s24 = sld [smem:[#allocation6_spill]] }
 0x3d7   : > { %p22_p11 = scmp.ge.s32.totalorder %s25_s22, 6   ;;  %s2336_s16 = sld [smem:[#allocation7_spill]] }
 0x3d8   : > { %s2337_s18 = smov %s1913_s20  ;;  %s2338_s19 = smov %s1917_s21 }
 0x3d9   :  { %24 = sbr.rel (!%p22_p11) target bundleno = 3 (0x3), region = 128 }
 0x3dc   : > { %s2339_s20 = smov %s2335_s24 }
 0x3dd   : > { %s2340_s21 = smov %s2336_s16 }

</bundles_post_ra>
